<compile_context>
chip_gen: v7x
topology: tpu7x:2x2x1
jax: 0.10.0
libtpu: 0.0.40
codegen_flags: <defaults>
</compile_context>

<pallas_src>
import jax
import jax.numpy as jnp
from jax.experimental import pallas as pl
from jax.experimental.pallas import tpu as pltpu


def _round_up(x, m):
    return ((x + m - 1) // m) * m


def _adapter_kernel(x_ref, w1_ref, b1_ref, w2_ref, b2_ref, o_ref):
    # x_ref: (tm, H), w1_ref: (H, Hr), b1_ref: (1, Hr) f32, w2_ref: (Hr, H),
    # b2_ref: (1, H) f32, o_ref: (tm, H)

    # Down-projection. Wrapper pre-matches weight/activation dtypes, so the
    # astype below is a no-op for matched operands; accumulation stays f32.
    h = jnp.dot(x_ref[...].astype(w1_ref.dtype), w1_ref[...],
                preferred_element_type=jnp.float32)
    h = jnp.maximum(h + b1_ref[...], 0.0)

    # Up-projection: cast hidden activations to the weight dtype so a bf16 W2
    # keeps the MXU in bf16 mode (no-op when W2 is f32).
    y = jnp.dot(h.astype(w2_ref.dtype), w2_ref[...],
                preferred_element_type=jnp.float32)
    y = y + b2_ref[...]

    # Residual: re-read X here (fresh VMEM load) instead of carrying an f32
    # copy of the tile across both matmuls.
    y = y + x_ref[...].astype(jnp.float32)

    o_ref[...] = y.astype(o_ref.dtype)


def _build_adapter_call(M, H, Hr, out_dtype, tm, vmem_limit_bytes, cost,
                        single_buffer_weights):
    grid = (pl.cdiv(M, tm),)

    # Constant index_map -> multi-buffering buys nothing; keep one resident
    # copy of the weights/biases in VMEM.
    wkw = dict(pipeline_mode=pl.Buffered(1)) if single_buffer_weights else {}

    grid_spec = pltpu.PrefetchScalarGridSpec(
        num_scalar_prefetch=0,
        grid=grid,
        in_specs=[
            pl.BlockSpec((tm, H), lambda i: (i, 0)),              # X row tile
            pl.BlockSpec((H, Hr), lambda i: (0, 0), **wkw),       # W1 (resident)
            pl.BlockSpec((1, Hr), lambda i: (0, 0), **wkw),       # b1 (resident)
            pl.BlockSpec((Hr, H), lambda i: (0, 0), **wkw),       # W2 (resident)
            pl.BlockSpec((1, H), lambda i: (0, 0), **wkw),        # b2 (resident)
        ],
        out_specs=pl.BlockSpec((tm, H), lambda i: (i, 0)),
    )

    return pl.pallas_call(
        _adapter_kernel,
        out_shape=jax.ShapeDtypeStruct((M, H), out_dtype),
        grid_spec=grid_spec,
        compiler_params=pltpu.CompilerParams(
            dimension_semantics=("parallel",),
            vmem_limit_bytes=vmem_limit_bytes),
        cost_estimate=cost,
    )


def adapter_forward(x, w1, b1, w2, b2, *, tm=None, vmem_limit_bytes=None):
    """x: [..., H]. Returns relu(x @ w1 + b1) @ w2 + b2 + x, same shape/dtype as x.

    w1: [H, Hr], b1: [Hr], w2: [Hr, H], b2: [H] (pre-transposed vs nn.Linear).
    """
    orig_shape = x.shape
    H = orig_shape[-1]
    x2d = x.reshape(-1, H)
    M = x2d.shape[0]
    Hr = w1.shape[1]

    # --- Match MXU operand dtypes once (host-side; weights are small and
    # resident). A bf16 x f32 dot falls back to the slow f32 MXU path.
    x_item = jnp.dtype(x.dtype).itemsize
    mxu_dtype = x.dtype if x_item <= jnp.dtype(w1.dtype).itemsize else w1.dtype
    if w1.dtype != mxu_dtype:
        w1 = w1.astype(mxu_dtype)
    if w2.dtype != mxu_dtype:
        w2 = w2.astype(mxu_dtype)
    w_item = jnp.dtype(mxu_dtype).itemsize

    # Pre-cast biases to f32 so the kernel does no per-tile up-casts.
    b1_2d = b1.reshape(1, Hr).astype(jnp.float32)
    b2_2d = b2.reshape(1, H).astype(jnp.float32)

    # --- Row tile. Alignment follows sublane packing (8 rows f32, 16 bf16,
    # 32 int8/fp8). Prefer >=2 grid steps so the "parallel" axis can shard
    # across both TensorCores on v7x (harmless on single-TC v5e/v6e).
    align = {4: 8, 2: 16, 1: 32}.get(x_item, 8)
    if tm is None:
        if M >= 1024:
            tm = 512
        else:
            tm = _round_up(pl.cdiv(max(M, 1), 2), align)
    tm = max(align, _round_up(int(tm), align))

    # No padding / slicing: grid covers M with a ragged last block.
    # (Pallas masks the out-of-bounds portion of the final output block.)

    # --- VMEM budget: double-buffered X/out row tiles + weights + in-kernel
    # f32 temporaries, with headroom, clamped to this generation's VMEM.
    if vmem_limit_bytes is None:
        tile_io = 2 * 2 * tm * H * x_item                       # X + out, 2 bufs each
        weights = 2 * ((H * Hr + Hr * H) * w_item + (Hr + H) * 4)  # worst case
        temps = tm * H * 4 + tm * Hr * (4 + w_item)             # f32 y + f32 h + cast
        est = tile_io + weights + temps
        try:
            cap = int(getattr(pltpu.get_tpu_info(), "vmem_capacity_bytes",
                              64 * 1024 * 1024))
        except Exception:  # pragma: no cover - conservative fallback
            cap = 64 * 1024 * 1024                              # safe on all gens
        vmem_limit_bytes = int(min(max(int(1.5 * est), 32 * 1024 * 1024),
                                   int(0.875 * cap)))

    cost = pl.CostEstimate(
        flops=4 * M * H * Hr,                                   # two matmuls
        transcendentals=0,
        bytes_accessed=2 * M * H * x_item
        + (H * Hr + Hr * H) * w_item + (Hr + H) * 4,
    )

    def run(single_buffer_weights):
        call = _build_adapter_call(M, H, Hr, x.dtype, tm, vmem_limit_bytes,
                                   cost, single_buffer_weights)
        return call(x2d, w1, b1_2d, w2, b2_2d)

    try:
        out = run(True)
    except Exception:
        # Older runtimes may reject pipeline_mode=pl.Buffered(1); fall back to
        # default (double-buffered) weight specs.
        out = run(False)

    return out.reshape(orig_shape)


def init_adapter_params(key, input_size, reduction_factor, std=0.01,
                        dtype=jnp.float32):
    """Mimics AdapterLayer.init_weights: normal(std) clamped to +/- 2*std.
    Weights are stored transposed ([in, out]) for the kernel. For production
    use store weights in bf16 (dtype=jnp.bfloat16) to halve HBM traffic."""
    hr = input_size // reduction_factor
    k1, k2, k3, k4 = jax.random.split(key, 4)
    clip = 2.0 * std
    w1 = jnp.clip(jax.random.normal(k1, (input_size, hr), dtype) * std, -clip, clip)
    b1 = jnp.clip(jax.random.normal(k2, (hr,), dtype) * std, -clip, clip)
    w2 = jnp.clip(jax.random.normal(k3, (hr, input_size), dtype) * std, -clip, clip)
    b2 = jnp.clip(jax.random.normal(k4, (input_size,), dtype) * std, -clip, clip)
    return w1, b1, w2, b2


def _reference(x, w1, b1, w2, b2):
    return jnp.maximum(x @ w1 + b1, 0.0) @ w2 + b2 + x


if __name__ == "__main__":
    key = jax.random.PRNGKey(0)
    k_x, k_p, k_x2 = jax.random.split(key, 3)

    # Small shapes consistent with the module's toy usage.
    batch, seq, hidden = 2, 8, 32
    reduction_factor = 4

    x = jax.random.normal(k_x, (batch, seq, hidden), jnp.float32)
    w1, b1, w2, b2 = init_adapter_params(k_p, hidden, reduction_factor)

    out = adapter_forward(x, w1, b1, w2, b2)
    out = jax.block_until_ready(out)
    ref = _reference(x, w1, b1, w2, b2)
    assert out.shape == x.shape
    assert jnp.allclose(out, ref, atol=1e-5, rtol=1e-5)

    # Second check: ragged row count + multi-step grid with a ragged last
    # block (M=35, tm=16 -> 3 grid steps, last block only 3 valid rows).
    x2 = jax.random.normal(k_x2, (5, 7, hidden), jnp.float32)
    out2 = adapter_forward(x2, w1, b1, w2, b2, tm=16)
    out2 = jax.block_until_ready(out2)
    ref2 = _reference(x2, w1, b1, w2, b2)
    assert out2.shape == x2.shape
    assert jnp.allclose(out2, ref2, atol=1e-5, rtol=1e-5)

    print("KERNEL_OK")
</pallas_src>

<mosaic_0001>
module attributes {stable_mosaic.version = 11 : i64} {
  func.func @_adapter_kernel(%arg0: i32, %arg1: memref<8x32xf32, #tpu.memory_space<vmem>>, %arg2: memref<32x8xf32, #tpu.memory_space<vmem>>, %arg3: memref<1x8xf32, #tpu.memory_space<vmem>>, %arg4: memref<8x32xf32, #tpu.memory_space<vmem>>, %arg5: memref<1x32xf32, #tpu.memory_space<vmem>>, %arg6: memref<8x32xf32, #tpu.memory_space<vmem>>) attributes {dimension_semantics = [#tpu.dimension_semantics<parallel>], iteration_bounds = array<i64: 2>, scalar_prefetch = 0 : i64, scratch_operands = 0 : i64, tpu.core_type = #tpu.core_type<tc>, window_params = [{transform_indices = @transform_0, window_bounds = array<i64: 8, 32>}, {pipeline_mode = #tpu.pipeline_mode<synchronous>, transform_indices = @transform_1, window_bounds = array<i64: 32, 8>}, {pipeline_mode = #tpu.pipeline_mode<synchronous>, transform_indices = @transform_2, window_bounds = array<i64: 1, 8>}, {pipeline_mode = #tpu.pipeline_mode<synchronous>, transform_indices = @transform_3, window_bounds = array<i64: 8, 32>}, {pipeline_mode = #tpu.pipeline_mode<synchronous>, transform_indices = @transform_4, window_bounds = array<i64: 1, 32>}, {transform_indices = @transform_5, window_bounds = array<i64: 8, 32>}]} {
    %c0 = arith.constant 0 : index
    %c0_0 = arith.constant 0 : index
    %0 = vector.load %arg1[%c0, %c0_0] : memref<8x32xf32, #tpu.memory_space<vmem>>, vector<8x32xf32>
    %c0_1 = arith.constant 0 : index
    %c0_2 = arith.constant 0 : index
    %1 = vector.load %arg2[%c0_1, %c0_2] : memref<32x8xf32, #tpu.memory_space<vmem>>, vector<32x8xf32>
    %cst = arith.constant dense<0.000000e+00> : vector<8x8xf32>
    %2 = tpu.matmul %0, %1, %cst {dimension_numbers = #tpu.dot_dimension_numbers<[1], [0], [0], [1], [0, 0, 1, 1], [], []>} : vector<8x32xf32>, vector<32x8xf32>, vector<8x8xf32> -> vector<8x8xf32>
    %c0_3 = arith.constant 0 : index
    %c0_4 = arith.constant 0 : index
    %3 = vector.load %arg3[%c0_3, %c0_4] : memref<1x8xf32, #tpu.memory_space<vmem>>, vector<1x8xf32>
    %4 = vector.broadcast %3 : vector<1x8xf32> to vector<8x8xf32>
    %5 = arith.addf %2, %4 : vector<8x8xf32>
    %cst_5 = arith.constant 0.000000e+00 : f32
    %6 = vector.broadcast %cst_5 : f32 to vector<8x8xf32>
    %7 = arith.maximumf %5, %6 : vector<8x8xf32>
    %c0_6 = arith.constant 0 : index
    %c0_7 = arith.constant 0 : index
    %8 = vector.load %arg4[%c0_6, %c0_7] : memref<8x32xf32, #tpu.memory_space<vmem>>, vector<8x32xf32>
    %cst_8 = arith.constant dense<0.000000e+00> : vector<8x32xf32>
    %9 = tpu.matmul %7, %8, %cst_8 {dimension_numbers = #tpu.dot_dimension_numbers<[1], [0], [0], [1], [0, 0, 1, 1], [], []>} : vector<8x8xf32>, vector<8x32xf32>, vector<8x32xf32> -> vector<8x32xf32>
    %c0_9 = arith.constant 0 : index
    %c0_10 = arith.constant 0 : index
    %10 = vector.load %arg5[%c0_9, %c0_10] : memref<1x32xf32, #tpu.memory_space<vmem>>, vector<1x32xf32>
    %11 = vector.broadcast %10 : vector<1x32xf32> to vector<8x32xf32>
    %12 = arith.addf %9, %11 : vector<8x32xf32>
    %c0_11 = arith.constant 0 : index
    %c0_12 = arith.constant 0 : index
    %13 = vector.load %arg1[%c0_11, %c0_12] : memref<8x32xf32, #tpu.memory_space<vmem>>, vector<8x32xf32>
    %14 = arith.addf %12, %13 : vector<8x32xf32>
    %c0_13 = arith.constant 0 : index
    %c0_14 = arith.constant 0 : index
    %15 = vector.load %arg6[%c0_13, %c0_14] : memref<8x32xf32, #tpu.memory_space<vmem>>, vector<8x32xf32>
    tpu.vector_store %arg6[%c0_13, %c0_14], %14 {strides = array<i32>} : memref<8x32xf32, #tpu.memory_space<vmem>>, vector<8x32xf32>,
    return
  }
  func.func @transform_0(%arg0: i32) -> (i32, i32) {
    %c0_i32 = arith.constant 0 : i32
    %c0_i32_0 = arith.constant 0 : i32
    return %arg0, %c0_i32 : i32, i32
  }
  func.func @transform_1(%arg0: i32) -> (i32, i32) {
    %c0_i32 = arith.constant 0 : i32
    %c0_i32_0 = arith.constant 0 : i32
    %c0_i32_1 = arith.constant 0 : i32
    return %c0_i32, %c0_i32_0 : i32, i32
  }
  func.func @transform_2(%arg0: i32) -> (i32, i32) {
    %c0_i32 = arith.constant 0 : i32
    %c0_i32_0 = arith.constant 0 : i32
    %c0_i32_1 = arith.constant 0 : i32
    return %c0_i32, %c0_i32_0 : i32, i32
  }
  func.func @transform_3(%arg0: i32) -> (i32, i32) {
    %c0_i32 = arith.constant 0 : i32
    %c0_i32_0 = arith.constant 0 : i32
    %c0_i32_1 = arith.constant 0 : i32
    return %c0_i32, %c0_i32_0 : i32, i32
  }
  func.func @transform_4(%arg0: i32) -> (i32, i32) {
    %c0_i32 = arith.constant 0 : i32
    %c0_i32_0 = arith.constant 0 : i32
    %c0_i32_1 = arith.constant 0 : i32
    return %c0_i32, %c0_i32_0 : i32, i32
  }
  func.func @transform_5(%arg0: i32) -> (i32, i32) {
    %c0_i32 = arith.constant 0 : i32
    %c0_i32_0 = arith.constant 0 : i32
    return %arg0, %c0_i32 : i32, i32
  }
}

module attributes {stable_mosaic.version = 11 : i64} {
  func.func @_adapter_kernel(%arg0: i32, %arg1: memref<8x32xf32, #tpu.memory_space<vmem>>, %arg2: memref<32x8xf32, #tpu.memory_space<vmem>>, %arg3: memref<1x8xf32, #tpu.memory_space<vmem>>, %arg4: memref<8x32xf32, #tpu.memory_space<vmem>>, %arg5: memref<1x32xf32, #tpu.memory_space<vmem>>, %arg6: memref<8x32xf32, #tpu.memory_space<vmem>>) attributes {dimension_semantics = [#tpu.dimension_semantics<parallel>], iteration_bounds = array<i64: 2>, scalar_prefetch = 0 : i64, scratch_operands = 0 : i64, tpu.core_type = #tpu.core_type<tc>, window_params = [{transform_indices = @transform_0, window_bounds = array<i64: 8, 32>}, {pipeline_mode = #tpu.pipeline_mode<synchronous>, transform_indices = @transform_1, window_bounds = array<i64: 32, 8>}, {pipeline_mode = #tpu.pipeline_mode<synchronous>, transform_indices = @transform_2, window_bounds = array<i64: 1, 8>}, {pipeline_mode = #tpu.pipeline_mode<synchronous>, transform_indices = @transform_3, window_bounds = array<i64: 8, 32>}, {pipeline_mode = #tpu.pipeline_mode<synchronous>, transform_indices = @transform_4, window_bounds = array<i64: 1, 32>}, {transform_indices = @transform_5, window_bounds = array<i64: 8, 32>}]} {
    %c0 = arith.constant 0 : index
    %c0_0 = arith.constant 0 : index
    %0 = vector.load %arg1[%c0, %c0_0] : memref<8x32xf32, #tpu.memory_space<vmem>>, vector<8x32xf32>
    %c0_1 = arith.constant 0 : index
    %c0_2 = arith.constant 0 : index
    %1 = vector.load %arg2[%c0_1, %c0_2] : memref<32x8xf32, #tpu.memory_space<vmem>>, vector<32x8xf32>
    %cst = arith.constant dense<0.000000e+00> : vector<8x8xf32>
    %2 = tpu.matmul %0, %1, %cst {dimension_numbers = #tpu.dot_dimension_numbers<[1], [0], [0], [1], [0, 0, 1, 1], [], []>} : vector<8x32xf32>, vector<32x8xf32>, vector<8x8xf32> -> vector<8x8xf32>
    %c0_3 = arith.constant 0 : index
    %c0_4 = arith.constant 0 : index
    %3 = vector.load %arg3[%c0_3, %c0_4] : memref<1x8xf32, #tpu.memory_space<vmem>>, vector<1x8xf32>
    %4 = vector.broadcast %3 : vector<1x8xf32> to vector<8x8xf32>
    %5 = arith.addf %2, %4 : vector<8x8xf32>
    %cst_5 = arith.constant 0.000000e+00 : f32
    %6 = vector.broadcast %cst_5 : f32 to vector<8x8xf32>
    %7 = arith.maximumf %5, %6 : vector<8x8xf32>
    %c0_6 = arith.constant 0 : index
    %c0_7 = arith.constant 0 : index
    %8 = vector.load %arg4[%c0_6, %c0_7] : memref<8x32xf32, #tpu.memory_space<vmem>>, vector<8x32xf32>
    %cst_8 = arith.constant dense<0.000000e+00> : vector<8x32xf32>
    %9 = tpu.matmul %7, %8, %cst_8 {dimension_numbers = #tpu.dot_dimension_numbers<[1], [0], [0], [1], [0, 0, 1, 1], [], []>} : vector<8x8xf32>, vector<8x32xf32>, vector<8x32xf32> -> vector<8x32xf32>
    %c0_9 = arith.constant 0 : index
    %c0_10 = arith.constant 0 : index
    %10 = vector.load %arg5[%c0_9, %c0_10] : memref<1x32xf32, #tpu.memory_space<vmem>>, vector<1x32xf32>
    %11 = vector.broadcast %10 : vector<1x32xf32> to vector<8x32xf32>
    %12 = arith.addf %9, %11 : vector<8x32xf32>
    %c0_11 = arith.constant 0 : index
    %c0_12 = arith.constant 0 : index
    %13 = vector.load %arg1[%c0_11, %c0_12] : memref<8x32xf32, #tpu.memory_space<vmem>>, vector<8x32xf32>
    %14 = arith.addf %12, %13 : vector<8x32xf32>
    %c0_13 = arith.constant 0 : index
    %c0_14 = arith.constant 0 : index
    %15 = vector.load %arg6[%c0_13, %c0_14] : memref<8x32xf32, #tpu.memory_space<vmem>>, vector<8x32xf32>
    tpu.vector_store %arg6[%c0_13, %c0_14], %14 {strides = array<i32>} : memref<8x32xf32, #tpu.memory_space<vmem>>, vector<8x32xf32>,
    return
  }
  func.func @transform_0(%arg0: i32) -> (i32, i32) {
    %c0_i32 = arith.constant 0 : i32
    %c0_i32_0 = arith.constant 0 : i32
    return %arg0, %c0_i32 : i32, i32
  }
  func.func @transform_1(%arg0: i32) -> (i32, i32) {
    %c0_i32 = arith.constant 0 : i32
    %c0_i32_0 = arith.constant 0 : i32
    %c0_i32_1 = arith.constant 0 : i32
    return %c0_i32, %c0_i32_0 : i32, i32
  }
  func.func @transform_2(%arg0: i32) -> (i32, i32) {
    %c0_i32 = arith.constant 0 : i32
    %c0_i32_0 = arith.constant 0 : i32
    %c0_i32_1 = arith.constant 0 : i32
    return %c0_i32, %c0_i32_0 : i32, i32
  }
  func.func @transform_3(%arg0: i32) -> (i32, i32) {
    %c0_i32 = arith.constant 0 : i32
    %c0_i32_0 = arith.constant 0 : i32
    %c0_i32_1 = arith.constant 0 : i32
    return %c0_i32, %c0_i32_0 : i32, i32
  }
  func.func @transform_4(%arg0: i32) -> (i32, i32) {
    %c0_i32 = arith.constant 0 : i32
    %c0_i32_0 = arith.constant 0 : i32
    %c0_i32_1 = arith.constant 0 : i32
    return %c0_i32, %c0_i32_0 : i32, i32
  }
  func.func @transform_5(%arg0: i32) -> (i32, i32) {
    %c0_i32 = arith.constant 0 : i32
    %c0_i32_0 = arith.constant 0 : i32
    return %arg0, %c0_i32 : i32, i32
  }
}

</mosaic_0001>

<bundles_post_ra>
// kernel: tpu_custom_call.1
= control target key start
LH: loop header
LB: loop body
LE: loop exit
PB: predicated region body
PF: predicated region fallthrough
CT: control target
= control target key end

     0   :  { %10 = vsyncpa [#allocation3], 0  ;;  %s770_s0 = inlined_call_operand.vmem [shape: f32[16,32], index: 0, kind: input, shape index: {}]   ;;  %s771_s1 = inlined_call_operand.vmem [shape: f32[32,8], index: 1, kind: input, shape index: {}]   ;;  %s772_s2 = inlined_call_operand.vmem [shape: f32[1,8], index: 2, kind: input, shape index: {}]   ;;  %s773_s3 = inlined_call_operand.vmem [shape: f32[8,32], index: 3, kind: input, shape index: {}]   ;;  %s774_s4 = inlined_call_operand.vmem [shape: f32[1,32], index: 4, kind: input, shape index: {}]   ;;  %s775_s5 = inlined_call_operand.hbm [shape: f32[16,32], index: 5, kind: output, shape index: {}]  }
   0x1   :  { %12 = vsyncpa [#allocation3 + $0x1], 0  ;;  %s647_s18 = smov 0   ;;  %s649_s19 = smov 0  }
   0x2   :  { %s651_s20 = smov 0   ;;  %s653_s21 = smov 0  }
   0x3 LB: > { %s668_s22 = sadd.s32 4294967295, %s611_s21   ;;  %s464_s23 = sadd.s32 4294967294, %s611_s21   ;;  %s611_s21 = sphi %s653_s21, %s781_s21   ;;  %s607_s20 = sphi %s651_s20, %s780_s20   ;;  %s603_s19 = sphi %s649_s19, %s779_s19   ;;  %s599_s18 = sphi %s647_s18, %s778_s18  }
   0x4   : > { %s672_s24 = sadd.s32 1, %s611_s21   ;;  %s135_s25 = sadd.s32 1, %s607_s20 }
   0x5   : > { %s132_s26 = ssub.s32 %s611_s21, %s672_s24  ;;  %p145_p0 = scmp.ne.s32.totalorder %s607_s20, %s603_s19 }
   0x6   : > { %p133_p1 = scmp.eq.s32.totalorder %s132_s26, 0  ;;  %p146_p2 = scmp.eq.s32.totalorder %s668_s22, 1 }
   0x7   : > { %p151_p3 = scmp.ne.s32.totalorder %s603_s19, %s599_s18  ;;  %p152_p4 = scmp.eq.s32.totalorder %s464_s23, 1 }
   0x8   : > { %s683_s27 = scalar_select %p133_p1, %s607_s20, %s135_s25  }
   0x9   : > { %p685_p5 = por %p146_p2, %p145_p0  ;;  %p689_p6 = por %p152_p4, %p151_p3 }
   0xa   : > { %p467_p7 = scmp.ge.s32.totalorder %s611_s21, 1  ;;  %p189_p8 = scmp.lt.s32.totalorder %s611_s21, 3 }
   0xc   : > { %p190_p9 = pnand %p467_p7, %p189_p8 }
   0xd   : > { %v221_v0 = vld [vmem:[%s771_s1] sm:$0xff] (!%p190_p9)  ;;  %v222_v1 = vld [vmem:[%s771_s1 + $0x8] sm:$0xff] (!%p190_p9)  ;;  %v223_v2 = vld [vmem:[%s771_s1 + $0x10] sm:$0xff] (!%p190_p9)  ;;  %v613_v3 = vmov (!%p190_p9), 0.0|0.0   ;;  %vm614_vm0 = vmmov (!%p190_p9), 0   ;;  %v615_v6 = vmov (!%p190_p9), 0.0  }
   0xe   : > { %193 = sbr.rel (%p190_p9) target bundleno = 472 (0x1d8), region = 40  ;;  %501 = vmatprep.subr.bf16.mxu0 (!%p190_p9), %v613_v3  ;;  %v502_v4 = vpack.c.bf16 (!%p190_p9), %v222_v1, %v221_v0  ;;  %v224_v5 = vld [vmem:[%s771_s1 + $0x18] sm:$0xff] (!%p190_p9)  ;;  %493 = vmatprep.mubr.msk.f32.mxu0 (!%p190_p9), %vm614_vm0, %v615_v6  ;;  %p216_p10 = scmp.lt.s32.totalorder (!%p190_p9), %s668_s22, 1  ;;  %vm232_vm1 = vcmask (!%p190_p9), 261120   ;;  %v307_v9 = vld [vmem:[%s773_s3] sm:$0xff] (!%p190_p9)  ;;  %vm315_vm2 = vcmask (!%p190_p9), 64512  }
   0xf   : > { %496 = vmatprep.subr.mxu1 (!%p190_p9), %v615_v6  ;;  %498 = vmatprep.mubr.msk.f32.mxu1 (!%p190_p9), %vm614_vm0, %v615_v6  ;;  %v505_v7 = vpack.c.bf16 (!%p190_p9), %v224_v5, %v223_v2  ;;  %v470_v10 = vld [vmem:[%s772_s2] ss:$0 sm:$0xff] (!%p190_p9)  ;;  %s213_s6 = sand.u32 (!%p190_p9), 1, %s603_s19   ;;  %s475_s10 = sshll.u32 (!%p190_p9), %s668_s22, 7 }
  0x10   : > { %503 = vmatpush3.bf16.msra.mxu0 (!%p190_p9), %v502_v4  ;;  %497 = vmatpush3.msra.mxu1 (!%p190_p9), %v307_v9  ;;  %s468_s7 = sshll.u32 (!%p190_p9), %s213_s6, 3  ;;  %v472_v15 = vld [vmem:[%s774_s4] ss:$0 sm:$0xff] (!%p190_p9)  ;;  %s727_s15 = scalar_lea.hbm (!%p190_p9), %s775_s5, %s475_s10 }
  0x11   : > { %504 = vmatprep.subr.bf16.mxu0 (!%p190_p9), %v613_v3  ;;  %s215_s11 = scalar_lea.vmem (!%p190_p9), [#allocation2], %s468_s7  ;;  %s392_s16 = scalar_lea.sflag (!%p190_p9), [#allocation3], %s213_s6 }
  0x12   : > { %s405_s12 = sshll.u32 (!%p190_p9), %s215_s11, 4  ;;  %s729_s12 = int_to_ptr.vmem [resolvable:$true] %s405_s12 }
  0x14   : > { %506 = vmatpush3.bf16.msra.mxu0 (!%p190_p9), %v505_v7 }
  0x15   : > { %s217_s13 = scalar_select %p216_p10, %s668_s22, 1 }
  0x16   : > { %s616_s22 = smov [#allocation2]  }
  0x17   : > { %s469_s14 = sshll.u32 %s217_s13, 3  ;;  %s553_s23 = sshll.u32 %s616_s22, 4  ;;  %s554_s23 = int_to_ptr.vmem [resolvable:$false] %s553_s23 }
  0x18   : > { %s219_s17 = scalar_lea.vmem %s770_s0, %s469_s14  ;;  %s555_s25 = scalar_lea.vmem %s554_s23, 256 }
  0x19   : > { %v220_v8 = vld [vmem:[%s219_s17] sm:$0xff]  ;;  %s549_s17 = scalar_lea.vmem %s729_s12, 128  ;;  %p556_p0 = scmp.lt.s32.totalorder %s729_s12, %s554_s23 }
  0x1a   : > { %494 = vmatmul.mubr.msk.f32.vlgmr.msra.gmra.mrb[0].mxu0 %vm232_vm1, %v220_v8  ;;  %p550_p11 = scmp.ne.s32.totalorder %s729_s12, %s549_s17  ;;  %p557_p1 = scmp.lt.s32.totalorder %s555_s25, %s549_s17 }
  0x1c   : > { %p551_p12 = pnand %p550_p11, %p685_p5  ;;  %p558_p2 = por %p557_p1, %p556_p0 }
  0x1e   : > { %p552_p13 = pneg %p551_p12 }
  0x20   : > { %p559_p3 = pnand %p558_p2, %p552_p13 }
  0xed   : > { %v302_v11 = vpop.f32.mrb[0].mxu0 }
  0xee   : > { %v303_v12 = vadd.f32 %v470_v10, %v302_v11  ;;  %v495_v13 = vpop.f32.mrb[1].mxu0 }
  0xf0   : > { %v306_v14 = vmax.f32 %v303_v12, 0.0 }
  0xf2   : > { %499 = vmatmul.mubr.msk.f32.vlgmr.msra.gmra.mrb[0].mxu1 %vm315_vm2, %v306_v14 }
 0x1c5   : > { %v385_v16 = vpop.f32.mrb[0].mxu1 }
 0x1c6   : > { %v386_v17 = vadd.f32 %v472_v15, %v385_v16  ;;  %v500_v18 = vpop.f32.mrb[1].mxu1 }
 0x1c8   : > { %v389_v19 = vadd.f32 %v386_v17, %v220_v8 }
 0x1ca   : > { %390 = vst.msk [vmem:[%s215_s11] sm:$0xff] %vm232_vm1, %v389_v19 }
 0x1cb   : > { %562 = shalt.err (!%p559_p3)
}
 0x1cc   : > { %s563_s26 = scalar_lea.hbm %s727_s15, 128  ;;  %s567_s7 = scalar_lea.hbm %s775_s5, 256 }
 0x1cd   : > { %p564_p4 = scmp.ne.s32.totalorder %s727_s15, %s563_s26  ;;  %p568_p9 = scmp.lt.u32.totalorder %s727_s15, %s775_s5 }
 0x1ce   : > { %p569_p10 = scmp.lt.u32.totalorder %s567_s7, %s563_s26  ;;  %p571_p12 = scmp.lt.u32.totalorder %s563_s26, %s727_s15 }
 0x1cf   : > { %p565_p7 = pnand %p564_p4, %p685_p5 }
 0x1d0   : > { %p570_p11 = por %p569_p10, %p568_p9 }
 0x1d1   : > { %p566_p8 = pneg %p565_p7 }
 0x1d2   : > { %p572_p13 = por %p571_p12, %p570_p11 }
 0x1d4   : > { %p573_p0 = pnand %p572_p13, %p566_p8 }
 0x1d6   : > { %576 = shalt.err (!%p573_p0)
}
 0x1d7   : > { %507 = dma.vmem_to_hbm [thread:$0]  (%p685_p5), %s729_s12, 128, %s727_s15, %s392_s16  }
 0x1d8 PF: > { %p513_p1 = scmp.ge.s32.totalorder %s611_s21, 2  ;;  %s417_s10 = sand.u32 1, %s599_s18  }
 0x1d9   : > { %s418_s11 = scalar_lea.sflag [#allocation3], %s417_s10 }
 0x1da   : > { %p510_p2 = pnand %p513_p1, %p689_p6 }
 0x1dc   : > { %594 = dma.done.wait (!%p510_p2), %s418_s11, 128  }
 0x1dd   : > { %596 = vsyncadd (!%p510_p2), %s418_s11, 4294967168  ;;  %p15_p3 = scmp.ge.s32.totalorder %s672_s24, 4   ;;  %s778_s18 = smov %s603_s19 }
 0x1de   : > { %s779_s19 = smov %s607_s20  ;;  %s780_s20 = smov %s683_s27 }
 0x1df   : > { %s781_s21 = smov %s672_s24  ;;  %17 = sbr.rel (!%p15_p3) target bundleno = 3 (0x3), region = 75 }
 0x1e6   :  { %423 = vsyncpa [#allocation3], 1 }
 0x1e7   :  { %425 = vsyncpa [#allocation3 + $0x1], 1 }

// kernel: tpu_custom_call.1
= control target key start
LH: loop header
LB: loop body
LE: loop exit
PB: predicated region body
PF: predicated region fallthrough
CT: control target
= control target key end

     0   :  { %10 = vsyncpa [#allocation3], 0  ;;  %s770_s0 = inlined_call_operand.vmem [shape: f32[16,32], index: 0, kind: input, shape index: {}]   ;;  %s771_s1 = inlined_call_operand.vmem [shape: f32[32,8], index: 1, kind: input, shape index: {}]   ;;  %s772_s2 = inlined_call_operand.vmem [shape: f32[1,8], index: 2, kind: input, shape index: {}]   ;;  %s773_s3 = inlined_call_operand.vmem [shape: f32[8,32], index: 3, kind: input, shape index: {}]   ;;  %s774_s4 = inlined_call_operand.vmem [shape: f32[1,32], index: 4, kind: input, shape index: {}]   ;;  %s775_s5 = inlined_call_operand.hbm [shape: f32[16,32], index: 5, kind: output, shape index: {}]  }
   0x1   :  { %12 = vsyncpa [#allocation3 + $0x1], 0  ;;  %s647_s18 = smov 0   ;;  %s649_s19 = smov 0  }
   0x2   :  { %s651_s20 = smov 0   ;;  %s653_s21 = smov 0  }
   0x3 LB: > { %s668_s22 = sadd.s32 4294967295, %s611_s21   ;;  %s464_s23 = sadd.s32 4294967294, %s611_s21   ;;  %s611_s21 = sphi %s653_s21, %s781_s21   ;;  %s607_s20 = sphi %s651_s20, %s780_s20   ;;  %s603_s19 = sphi %s649_s19, %s779_s19   ;;  %s599_s18 = sphi %s647_s18, %s778_s18  }
   0x4   : > { %s672_s24 = sadd.s32 1, %s611_s21   ;;  %s135_s25 = sadd.s32 1, %s607_s20 }
   0x5   : > { %s132_s26 = ssub.s32 %s611_s21, %s672_s24  ;;  %p145_p0 = scmp.ne.s32.totalorder %s607_s20, %s603_s19 }
   0x6   : > { %p133_p1 = scmp.eq.s32.totalorder %s132_s26, 0  ;;  %p146_p2 = scmp.eq.s32.totalorder %s668_s22, 1 }
   0x7   : > { %p151_p3 = scmp.ne.s32.totalorder %s603_s19, %s599_s18  ;;  %p152_p4 = scmp.eq.s32.totalorder %s464_s23, 1 }
   0x8   : > { %s683_s27 = scalar_select %p133_p1, %s607_s20, %s135_s25  }
   0x9   : > { %p685_p5 = por %p146_p2, %p145_p0  ;;  %p689_p6 = por %p152_p4, %p151_p3 }
   0xa   : > { %p467_p7 = scmp.ge.s32.totalorder %s611_s21, 1  ;;  %p189_p8 = scmp.lt.s32.totalorder %s611_s21, 3 }
   0xc   : > { %p190_p9 = pnand %p467_p7, %p189_p8 }
   0xd   : > { %v221_v0 = vld [vmem:[%s771_s1] sm:$0xff] (!%p190_p9)  ;;  %v222_v1 = vld [vmem:[%s771_s1 + $0x8] sm:$0xff] (!%p190_p9)  ;;  %v223_v2 = vld [vmem:[%s771_s1 + $0x10] sm:$0xff] (!%p190_p9)  ;;  %v613_v3 = vmov (!%p190_p9), 0.0|0.0   ;;  %vm614_vm0 = vmmov (!%p190_p9), 0   ;;  %v615_v6 = vmov (!%p190_p9), 0.0  }
   0xe   : > { %193 = sbr.rel (%p190_p9) target bundleno = 472 (0x1d8), region = 40  ;;  %501 = vmatprep.subr.bf16.mxu0 (!%p190_p9), %v613_v3  ;;  %v502_v4 = vpack.c.bf16 (!%p190_p9), %v222_v1, %v221_v0  ;;  %v224_v5 = vld [vmem:[%s771_s1 + $0x18] sm:$0xff] (!%p190_p9)  ;;  %493 = vmatprep.mubr.msk.f32.mxu0 (!%p190_p9), %vm614_vm0, %v615_v6  ;;  %p216_p10 = scmp.lt.s32.totalorder (!%p190_p9), %s668_s22, 1  ;;  %vm232_vm1 = vcmask (!%p190_p9), 261120   ;;  %v307_v9 = vld [vmem:[%s773_s3] sm:$0xff] (!%p190_p9)  ;;  %vm315_vm2 = vcmask (!%p190_p9), 64512  }
   0xf   : > { %496 = vmatprep.subr.mxu1 (!%p190_p9), %v615_v6  ;;  %498 = vmatprep.mubr.msk.f32.mxu1 (!%p190_p9), %vm614_vm0, %v615_v6  ;;  %v505_v7 = vpack.c.bf16 (!%p190_p9), %v224_v5, %v223_v2  ;;  %v470_v10 = vld [vmem:[%s772_s2] ss:$0 sm:$0xff] (!%p190_p9)  ;;  %s213_s6 = sand.u32 (!%p190_p9), 1, %s603_s19   ;;  %s475_s10 = sshll.u32 (!%p190_p9), %s668_s22, 7 }
  0x10   : > { %503 = vmatpush3.bf16.msra.mxu0 (!%p190_p9), %v502_v4  ;;  %497 = vmatpush3.msra.mxu1 (!%p190_p9), %v307_v9  ;;  %s468_s7 = sshll.u32 (!%p190_p9), %s213_s6, 3  ;;  %v472_v15 = vld [vmem:[%s774_s4] ss:$0 sm:$0xff] (!%p190_p9)  ;;  %s727_s15 = scalar_lea.hbm (!%p190_p9), %s775_s5, %s475_s10 }
  0x11   : > { %504 = vmatprep.subr.bf16.mxu0 (!%p190_p9), %v613_v3  ;;  %s215_s11 = scalar_lea.vmem (!%p190_p9), [#allocation2], %s468_s7  ;;  %s392_s16 = scalar_lea.sflag (!%p190_p9), [#allocation3], %s213_s6 }
  0x12   : > { %s405_s12 = sshll.u32 (!%p190_p9), %s215_s11, 4  ;;  %s729_s12 = int_to_ptr.vmem [resolvable:$true] %s405_s12 }
  0x14   : > { %506 = vmatpush3.bf16.msra.mxu0 (!%p190_p9), %v505_v7 }
  0x15   : > { %s217_s13 = scalar_select %p216_p10, %s668_s22, 1 }
  0x16   : > { %s616_s22 = smov [#allocation2]  }
  0x17   : > { %s469_s14 = sshll.u32 %s217_s13, 3  ;;  %s553_s23 = sshll.u32 %s616_s22, 4  ;;  %s554_s23 = int_to_ptr.vmem [resolvable:$false] %s553_s23 }
  0x18   : > { %s219_s17 = scalar_lea.vmem %s770_s0, %s469_s14  ;;  %s555_s25 = scalar_lea.vmem %s554_s23, 256 }
  0x19   : > { %v220_v8 = vld [vmem:[%s219_s17] sm:$0xff]  ;;  %s549_s17 = scalar_lea.vmem %s729_s12, 128  ;;  %p556_p0 = scmp.lt.s32.totalorder %s729_s12, %s554_s23 }
  0x1a   : > { %494 = vmatmul.mubr.msk.f32.vlgmr.msra.gmra.mrb[0].mxu0 %vm232_vm1, %v220_v8  ;;  %p550_p11 = scmp.ne.s32.totalorder %s729_s12, %s549_s17  ;;  %p557_p1 = scmp.lt.s32.totalorder %s555_s25, %s549_s17 }
  0x1c   : > { %p551_p12 = pnand %p550_p11, %p685_p5  ;;  %p558_p2 = por %p557_p1, %p556_p0 }
  0x1e   : > { %p552_p13 = pneg %p551_p12 }
  0x20   : > { %p559_p3 = pnand %p558_p2, %p552_p13 }
  0xed   : > { %v302_v11 = vpop.f32.mrb[0].mxu0 }
  0xee   : > { %v303_v12 = vadd.f32 %v470_v10, %v302_v11  ;;  %v495_v13 = vpop.f32.mrb[1].mxu0 }
  0xf0   : > { %v306_v14 = vmax.f32 %v303_v12, 0.0 }
  0xf2   : > { %499 = vmatmul.mubr.msk.f32.vlgmr.msra.gmra.mrb[0].mxu1 %vm315_vm2, %v306_v14 }
 0x1c5   : > { %v385_v16 = vpop.f32.mrb[0].mxu1 }
 0x1c6   : > { %v386_v17 = vadd.f32 %v472_v15, %v385_v16  ;;  %v500_v18 = vpop.f32.mrb[1].mxu1 }
 0x1c8   : > { %v389_v19 = vadd.f32 %v386_v17, %v220_v8 }
 0x1ca   : > { %390 = vst.msk [vmem:[%s215_s11] sm:$0xff] %vm232_vm1, %v389_v19 }
 0x1cb   : > { %562 = shalt.err (!%p559_p3)
}
 0x1cc   : > { %s563_s26 = scalar_lea.hbm %s727_s15, 128  ;;  %s567_s7 = scalar_lea.hbm %s775_s5, 256 }
 0x1cd   : > { %p564_p4 = scmp.ne.s32.totalorder %s727_s15, %s563_s26  ;;  %p568_p9 = scmp.lt.u32.totalorder %s727_s15, %s775_s5 }
 0x1ce   : > { %p569_p10 = scmp.lt.u32.totalorder %s567_s7, %s563_s26  ;;  %p571_p12 = scmp.lt.u32.totalorder %s563_s26, %s727_s15 }
 0x1cf   : > { %p565_p7 = pnand %p564_p4, %p685_p5 }
 0x1d0   : > { %p570_p11 = por %p569_p10, %p568_p9 }
 0x1d1   : > { %p566_p8 = pneg %p565_p7 }
 0x1d2   : > { %p572_p13 = por %p571_p12, %p570_p11 }
 0x1d4   : > { %p573_p0 = pnand %p572_p13, %p566_p8 }
 0x1d6   : > { %576 = shalt.err (!%p573_p0)
}
 0x1d7   : > { %507 = dma.vmem_to_hbm [thread:$0]  (%p685_p5), %s729_s12, 128, %s727_s15, %s392_s16  }
 0x1d8 PF: > { %p513_p1 = scmp.ge.s32.totalorder %s611_s21, 2  ;;  %s417_s10 = sand.u32 1, %s599_s18  }
 0x1d9   : > { %s418_s11 = scalar_lea.sflag [#allocation3], %s417_s10 }
 0x1da   : > { %p510_p2 = pnand %p513_p1, %p689_p6 }
 0x1dc   : > { %594 = dma.done.wait (!%p510_p2), %s418_s11, 128  }
 0x1dd   : > { %596 = vsyncadd (!%p510_p2), %s418_s11, 4294967168  ;;  %p15_p3 = scmp.ge.s32.totalorder %s672_s24, 4   ;;  %s778_s18 = smov %s603_s19 }
 0x1de   : > { %s779_s19 = smov %s607_s20  ;;  %s780_s20 = smov %s683_s27 }
 0x1df   : > { %s781_s21 = smov %s672_s24  ;;  %17 = sbr.rel (!%p15_p3) target bundleno = 3 (0x3), region = 75 }
 0x1e6   :  { %423 = vsyncpa [#allocation3], 1 }
 0x1e7   :  { %425 = vsyncpa [#allocation3 + $0x1], 1 }

</bundles_post_ra>
